<compile_context>
chip_gen: v6e
topology: v6e:2x2x1
jax: 0.10.0
libtpu: 0.0.40
codegen_flags: <defaults>
</compile_context>

<pallas_src>
import functools

import jax
import jax.numpy as jnp
from jax.experimental import pallas as pl
from jax.experimental.pallas import tpu as pltpu

LANE = 128
SUBLANE = 8


def _round_up(x, m):
    return ((x + m - 1) // m) * m


def _cdiv(a, b):
    return (a + b - 1) // b


def _fused_mlp_kernel(x_ref, *refs, num_layers):
    """Whole MLP on one batch tile. refs = (w0, b0, ..., w_{L-1}, b_{L-1}, o_ref).

    Hidden layers run on the MXU with f32 accumulation; the final Dout=1 layer is a
    VPU broadcast-multiply + lane reduction so only a (tb, 1) tile is stored
    (no lane padding ever written back to HBM).
    """
    o_ref = refs[-1]
    h = x_ref[...].astype(jnp.float32)
    for i in range(num_layers - 1):
        w = refs[2 * i][...]
        b = refs[2 * i + 1][...]
        h = jnp.dot(h.astype(w.dtype), w, preferred_element_type=jnp.float32)
        h = jnp.maximum(h + b.astype(jnp.float32), 0.0)  # bias + ReLU in f32
    w_last = refs[2 * (num_layers - 1)][...].astype(jnp.float32)      # (1, Dpad)
    b_last = refs[2 * (num_layers - 1) + 1][...].astype(jnp.float32)  # (1, 1)
    out = jnp.sum(h * w_last, axis=-1, keepdims=True) + b_last        # (tb, 1)
    o_ref[...] = out.astype(o_ref.dtype)


def init_mlp_value_params(key, input_dim, hidden_dims):
    """Mirror nn.Linear default init: U(-1/sqrt(fan_in), +1/sqrt(fan_in))."""
    params = []
    dims = [input_dim] + list(hidden_dims) + [1]
    for i in range(len(dims) - 1):
        fan_in, fan_out = dims[i], dims[i + 1]
        key, kw, kb = jax.random.split(key, 3)
        bound = 1.0 / jnp.sqrt(jnp.float32(fan_in))
        w = jax.random.uniform(kw, (fan_in, fan_out), jnp.float32, -bound, bound)
        b = jax.random.uniform(kb, (fan_out,), jnp.float32, -bound, bound)
        params.append((w, b))
    return params


def pad_params_for_kernel(params, weight_dtype=jnp.bfloat16):
    """Pack parameters for the fused kernel.

    Hidden layers: output features zero-padded to multiples of 128 (lane dense),
    weights cast to `weight_dtype` (bf16 default for MXU throughput / half VMEM),
    biases kept f32.  Final layer (Dout must be 1): stored as a transposed f32 row
    vector (1, Dpad) so the kernel ends with a VPU multiply + lane reduction and a
    narrow (tb, 1) store.  Zero padding is exact.
    """
    padded = []
    prev_out_pad = params[0][0].shape[0]
    n = len(params)
    for idx, (w, b) in enumerate(params):
        din, dout = w.shape
        din_pad = prev_out_pad
        if idx == n - 1:
            assert dout == 1, "MLP_Value final layer must have out_features == 1"
            w_p = jnp.zeros((1, din_pad), jnp.float32)
            w_p = w_p.at[0, :din].set(w[:, 0].astype(jnp.float32))
            b_p = jnp.asarray(b, jnp.float32).reshape(1, 1)
        else:
            dout_pad = _round_up(dout, LANE)
            w_p = jnp.zeros((din_pad, dout_pad), weight_dtype)
            w_p = w_p.at[:din, :dout].set(w.astype(weight_dtype))
            b_p = jnp.zeros((1, dout_pad), jnp.float32)
            b_p = b_p.at[0, :dout].set(b.astype(jnp.float32))
            prev_out_pad = dout_pad
        padded.append((w_p, b_p))
    return padded


def _plan_tiles(B, din, padded_params, batch_tile):
    """Pick the batch tile from an actual VMEM-footprint estimate."""
    b_rounded = _round_up(max(B, 1), SUBLANE)
    act_widths = [din] + [w.shape[1] for w, _ in padded_params[:-1]]
    max_width = max(act_widths)
    weight_bytes = sum(int(w.size) * w.dtype.itemsize + int(b.size) * b.dtype.itemsize
                       for w, b in padded_params)
    # Per-row VMEM: double-buffered input + output tiles + ~2 widest f32 intermediates.
    per_row = 2 * din * 4 + 2 * 4 + 2 * max_width * 4
    tile_budget = 24 << 20  # conservative: fits v5e/v6e/v7x scoped VMEM with headroom
    cap = max(SUBLANE, (tile_budget - weight_bytes) // per_row)
    tb = min(batch_tile, cap, b_rounded)
    # Keep >= 2 grid steps when there is enough work so both v7x TensorCores are
    # used via dimension_semantics=("parallel",).  No effect on v5e/v6e (1 TC).
    if b_rounded >= 512:
        tb = min(tb, _round_up(_cdiv(b_rounded, 2), 256))
    tb = max(SUBLANE, (tb // SUBLANE) * SUBLANE)
    b_pad = _round_up(B, tb)
    # Explicit scoped-VMEM limit from the footprint, clamped to a safe range.
    footprint = weight_bytes + tb * per_row
    vmem_limit = int(min(max(int(1.5 * footprint) + (4 << 20), 32 << 20), 48 << 20))
    return tb, b_pad, vmem_limit


def mlp_value_forward(x, padded_params, *, batch_tile=1024):
    """x: (B, Din) f32, padded_params from pad_params_for_kernel -> (B, 1) f32."""
    B, din = x.shape
    num_layers = len(padded_params)
    tb, b_pad, vmem_limit = _plan_tiles(B, din, padded_params, batch_tile)
    if b_pad != B:
        x = jnp.pad(x, ((0, b_pad - B), (0, 0)))

    flat_params = []
    for w_p, b_p in padded_params:
        flat_params += [w_p, b_p]

    flops = 2 * b_pad * sum(int(w.size) for w, _ in padded_params)
    bytes_accessed = int(
        b_pad * din * x.dtype.itemsize
        + sum(int(w.size) * w.dtype.itemsize + int(b.size) * b.dtype.itemsize
              for w, b in padded_params)
        + b_pad * 4)  # narrow (B, 1) f32 output

    def call(single_buffer_weights):
        in_specs = [pl.BlockSpec((tb, din), lambda i: (i, 0))]  # batch-tiled input
        for w_p, b_p in padded_params:
            kw = {}
            if single_buffer_weights:
                # Resident operands don't need a second pipeline buffer (v7x VMEM hygiene).
                kw["pipeline_mode"] = pl.Buffered(1)
            in_specs.append(pl.BlockSpec(w_p.shape, lambda i: (0, 0), **kw))
            in_specs.append(pl.BlockSpec(b_p.shape, lambda i: (0, 0), **kw))
        return pl.pallas_call(
            functools.partial(_fused_mlp_kernel, num_layers=num_layers),
            out_shape=jax.ShapeDtypeStruct((b_pad, 1), jnp.float32),
            grid=(b_pad // tb,),
            in_specs=in_specs,
            out_specs=pl.BlockSpec((tb, 1), lambda i: (i, 0)),
            compiler_params=pltpu.CompilerParams(
                dimension_semantics=("parallel",),
                vmem_limit_bytes=vmem_limit),
            cost_estimate=pl.CostEstimate(
                flops=flops, transcendentals=0, bytes_accessed=bytes_accessed),
        )(x, *flat_params)

    try:
        out = call(True)
    except Exception:
        # Fallback if pipeline_mode=pl.Buffered(1) is unsupported on this JAX version.
        out = call(False)

    return out[:B, :]


def mlp_value_reference(x, params):
    h = x
    n = len(params)
    for i, (w, b) in enumerate(params):
        h = h @ w + b
        if i != n - 1:
            h = jnp.maximum(h, 0.0)
    return h


if __name__ == "__main__":
    key = jax.random.PRNGKey(0)
    k_x, k_x2, k_p = jax.random.split(key, 3)

    input_dim = 32
    hidden_dims = [64, 64]
    params = init_mlp_value_params(k_p, input_dim, hidden_dims)

    # Small-batch check with f32 weights -> tight tolerance vs the f32 reference.
    x_small = jax.random.normal(k_x, (8, input_dim), jnp.float32)
    out_small = mlp_value_forward(
        x_small, pad_params_for_kernel(params, weight_dtype=jnp.float32))
    out_small = jax.block_until_ready(out_small)
    ref_small = mlp_value_reference(x_small, params)
    assert out_small.shape == (8, 1), out_small.shape
    assert jnp.allclose(out_small, ref_small, atol=1e-4, rtol=1e-4), \
        "f32 path mismatch vs reference"

    # Multi-tile check (grid > 1, padded batch) with bf16 weights -> loose tolerance.
    x_big = jax.random.normal(k_x2, (1000, input_dim), jnp.float32)
    out_big = mlp_value_forward(
        x_big, pad_params_for_kernel(params, weight_dtype=jnp.bfloat16))
    out_big = jax.block_until_ready(out_big)
    ref_big = mlp_value_reference(x_big, params)
    assert out_big.shape == (1000, 1), out_big.shape
    assert jnp.allclose(out_big, ref_big, atol=5e-2, rtol=5e-2), \
        "bf16 path mismatch vs reference"

    print("KERNEL_OK")
</pallas_src>

<mosaic_0001>
module attributes {stable_mosaic.version = 11 : i64} {
  func.func @_fused_mlp_kernel(%arg0: i32, %arg1: memref<8x32xf32, #tpu.memory_space<vmem>>, %arg2: memref<32x128xf32, #tpu.memory_space<vmem>>, %arg3: memref<1x128xf32, #tpu.memory_space<vmem>>, %arg4: memref<128x128xf32, #tpu.memory_space<vmem>>, %arg5: memref<1x128xf32, #tpu.memory_space<vmem>>, %arg6: memref<1x128xf32, #tpu.memory_space<vmem>>, %arg7: memref<1x1xf32, #tpu.memory_space<vmem>>, %arg8: memref<8x1xf32, #tpu.memory_space<vmem>>) attributes {dimension_semantics = [#tpu.dimension_semantics<parallel>], iteration_bounds = array<i64: 1>, scalar_prefetch = 0 : i64, scratch_operands = 0 : i64, tpu.core_type = #tpu.core_type<tc>, window_params = [{transform_indices = @transform_0, window_bounds = array<i64: 8, 32>}, {pipeline_mode = #tpu.pipeline_mode<synchronous>, transform_indices = @transform_1, window_bounds = array<i64: 32, 128>}, {pipeline_mode = #tpu.pipeline_mode<synchronous>, transform_indices = @transform_2, window_bounds = array<i64: 1, 128>}, {pipeline_mode = #tpu.pipeline_mode<synchronous>, transform_indices = @transform_3, window_bounds = array<i64: 128, 128>}, {pipeline_mode = #tpu.pipeline_mode<synchronous>, transform_indices = @transform_4, window_bounds = array<i64: 1, 128>}, {pipeline_mode = #tpu.pipeline_mode<synchronous>, transform_indices = @transform_5, window_bounds = array<i64: 1, 128>}, {pipeline_mode = #tpu.pipeline_mode<synchronous>, transform_indices = @transform_6, window_bounds = array<i64: 1, 1>}, {transform_indices = @transform_7, window_bounds = array<i64: 8, 1>}]} {
    %c0 = arith.constant 0 : index
    %c0_0 = arith.constant 0 : index
    %0 = vector.load %arg1[%c0, %c0_0] : memref<8x32xf32, #tpu.memory_space<vmem>>, vector<8x32xf32>
    %c0_1 = arith.constant 0 : index
    %c0_2 = arith.constant 0 : index
    %1 = vector.load %arg2[%c0_1, %c0_2] : memref<32x128xf32, #tpu.memory_space<vmem>>, vector<32x128xf32>
    %c0_3 = arith.constant 0 : index
    %c0_4 = arith.constant 0 : index
    %2 = vector.load %arg3[%c0_3, %c0_4] : memref<1x128xf32, #tpu.memory_space<vmem>>, vector<1x128xf32>
    %cst = arith.constant dense<0.000000e+00> : vector<8x128xf32>
    %3 = tpu.matmul %0, %1, %cst {dimension_numbers = #tpu.dot_dimension_numbers<[1], [0], [0], [1], [0, 0, 1, 1], [], []>} : vector<8x32xf32>, vector<32x128xf32>, vector<8x128xf32> -> vector<8x128xf32>
    %4 = vector.broadcast %2 : vector<1x128xf32> to vector<8x128xf32>
    %5 = arith.addf %3, %4 : vector<8x128xf32>
    %cst_5 = arith.constant 0.000000e+00 : f32
    %6 = vector.broadcast %cst_5 : f32 to vector<8x128xf32>
    %7 = arith.maximumf %5, %6 : vector<8x128xf32>
    %c0_6 = arith.constant 0 : index
    %c0_7 = arith.constant 0 : index
    %8 = vector.load %arg4[%c0_6, %c0_7] : memref<128x128xf32, #tpu.memory_space<vmem>>, vector<128x128xf32>
    %c0_8 = arith.constant 0 : index
    %c0_9 = arith.constant 0 : index
    %9 = vector.load %arg5[%c0_8, %c0_9] : memref<1x128xf32, #tpu.memory_space<vmem>>, vector<1x128xf32>
    %cst_10 = arith.constant dense<0.000000e+00> : vector<8x128xf32>
    %10 = tpu.matmul %7, %8, %cst_10 {dimension_numbers = #tpu.dot_dimension_numbers<[1], [0], [0], [1], [0, 0, 1, 1], [], []>} : vector<8x128xf32>, vector<128x128xf32>, vector<8x128xf32> -> vector<8x128xf32>
    %11 = vector.broadcast %9 : vector<1x128xf32> to vector<8x128xf32>
    %12 = arith.addf %10, %11 : vector<8x128xf32>
    %cst_11 = arith.constant 0.000000e+00 : f32
    %13 = vector.broadcast %cst_11 : f32 to vector<8x128xf32>
    %14 = arith.maximumf %12, %13 : vector<8x128xf32>
    %c0_12 = arith.constant 0 : index
    %c0_13 = arith.constant 0 : index
    %15 = vector.load %arg6[%c0_12, %c0_13] : memref<1x128xf32, #tpu.memory_space<vmem>>, vector<1x128xf32>
    %c0_14 = arith.constant 0 : index
    %c0_15 = arith.constant 0 : index
    %16 = vector.load %arg7[%c0_14, %c0_15] : memref<1x1xf32, #tpu.memory_space<vmem>>, vector<1x1xf32>
    %17 = vector.broadcast %15 : vector<1x128xf32> to vector<8x128xf32>
    %18 = arith.mulf %14, %17 : vector<8x128xf32>
    %cst_16 = arith.constant dense<0.000000e+00> : vector<8xf32>
    %19 = vector.multi_reduction <add>, %18, %cst_16 [1] : vector<8x128xf32> to vector<8xf32>
    %20 = vector.shape_cast %19 : vector<8xf32> to vector<8x1xf32>
    %21 = vector.broadcast %16 : vector<1x1xf32> to vector<8x1xf32>
    %22 = arith.addf %20, %21 : vector<8x1xf32>
    %c0_17 = arith.constant 0 : index
    %c0_18 = arith.constant 0 : index
    %23 = vector.load %arg8[%c0_17, %c0_18] : memref<8x1xf32, #tpu.memory_space<vmem>>, vector<8x1xf32>
    tpu.vector_store %arg8[%c0_17, %c0_18], %22 {strides = array<i32>} : memref<8x1xf32, #tpu.memory_space<vmem>>, vector<8x1xf32>,
    return
  }
  func.func @transform_0(%arg0: i32) -> (i32, i32) {
    %c0_i32 = arith.constant 0 : i32
    %c0_i32_0 = arith.constant 0 : i32
    return %arg0, %c0_i32 : i32, i32
  }
  func.func @transform_1(%arg0: i32) -> (i32, i32) {
    %c0_i32 = arith.constant 0 : i32
    %c0_i32_0 = arith.constant 0 : i32
    %c0_i32_1 = arith.constant 0 : i32
    return %c0_i32, %c0_i32_0 : i32, i32
  }
  func.func @transform_2(%arg0: i32) -> (i32, i32) {
    %c0_i32 = arith.constant 0 : i32
    %c0_i32_0 = arith.constant 0 : i32
    %c0_i32_1 = arith.constant 0 : i32
    return %c0_i32, %c0_i32_0 : i32, i32
  }
  func.func @transform_3(%arg0: i32) -> (i32, i32) {
    %c0_i32 = arith.constant 0 : i32
    %c0_i32_0 = arith.constant 0 : i32
    %c0_i32_1 = arith.constant 0 : i32
    return %c0_i32, %c0_i32_0 : i32, i32
  }
  func.func @transform_4(%arg0: i32) -> (i32, i32) {
    %c0_i32 = arith.constant 0 : i32
    %c0_i32_0 = arith.constant 0 : i32
    %c0_i32_1 = arith.constant 0 : i32
    return %c0_i32, %c0_i32_0 : i32, i32
  }
  func.func @transform_5(%arg0: i32) -> (i32, i32) {
    %c0_i32 = arith.constant 0 : i32
    %c0_i32_0 = arith.constant 0 : i32
    %c0_i32_1 = arith.constant 0 : i32
    return %c0_i32, %c0_i32_0 : i32, i32
  }
  func.func @transform_6(%arg0: i32) -> (i32, i32) {
    %c0_i32 = arith.constant 0 : i32
    %c0_i32_0 = arith.constant 0 : i32
    %c0_i32_1 = arith.constant 0 : i32
    return %c0_i32, %c0_i32_0 : i32, i32
  }
  func.func @transform_7(%arg0: i32) -> (i32, i32) {
    %c0_i32 = arith.constant 0 : i32
    %c0_i32_0 = arith.constant 0 : i32
    return %arg0, %c0_i32 : i32, i32
  }
}

module attributes {stable_mosaic.version = 11 : i64} {
  func.func @_fused_mlp_kernel(%arg0: i32, %arg1: memref<8x32xf32, #tpu.memory_space<vmem>>, %arg2: memref<32x128xf32, #tpu.memory_space<vmem>>, %arg3: memref<1x128xf32, #tpu.memory_space<vmem>>, %arg4: memref<128x128xf32, #tpu.memory_space<vmem>>, %arg5: memref<1x128xf32, #tpu.memory_space<vmem>>, %arg6: memref<1x128xf32, #tpu.memory_space<vmem>>, %arg7: memref<1x1xf32, #tpu.memory_space<vmem>>, %arg8: memref<8x1xf32, #tpu.memory_space<vmem>>) attributes {dimension_semantics = [#tpu.dimension_semantics<parallel>], iteration_bounds = array<i64: 1>, scalar_prefetch = 0 : i64, scratch_operands = 0 : i64, tpu.core_type = #tpu.core_type<tc>, window_params = [{transform_indices = @transform_0, window_bounds = array<i64: 8, 32>}, {pipeline_mode = #tpu.pipeline_mode<synchronous>, transform_indices = @transform_1, window_bounds = array<i64: 32, 128>}, {pipeline_mode = #tpu.pipeline_mode<synchronous>, transform_indices = @transform_2, window_bounds = array<i64: 1, 128>}, {pipeline_mode = #tpu.pipeline_mode<synchronous>, transform_indices = @transform_3, window_bounds = array<i64: 128, 128>}, {pipeline_mode = #tpu.pipeline_mode<synchronous>, transform_indices = @transform_4, window_bounds = array<i64: 1, 128>}, {pipeline_mode = #tpu.pipeline_mode<synchronous>, transform_indices = @transform_5, window_bounds = array<i64: 1, 128>}, {pipeline_mode = #tpu.pipeline_mode<synchronous>, transform_indices = @transform_6, window_bounds = array<i64: 1, 1>}, {transform_indices = @transform_7, window_bounds = array<i64: 8, 1>}]} {
    %c0 = arith.constant 0 : index
    %c0_0 = arith.constant 0 : index
    %0 = vector.load %arg1[%c0, %c0_0] : memref<8x32xf32, #tpu.memory_space<vmem>>, vector<8x32xf32>
    %c0_1 = arith.constant 0 : index
    %c0_2 = arith.constant 0 : index
    %1 = vector.load %arg2[%c0_1, %c0_2] : memref<32x128xf32, #tpu.memory_space<vmem>>, vector<32x128xf32>
    %c0_3 = arith.constant 0 : index
    %c0_4 = arith.constant 0 : index
    %2 = vector.load %arg3[%c0_3, %c0_4] : memref<1x128xf32, #tpu.memory_space<vmem>>, vector<1x128xf32>
    %cst = arith.constant dense<0.000000e+00> : vector<8x128xf32>
    %3 = tpu.matmul %0, %1, %cst {dimension_numbers = #tpu.dot_dimension_numbers<[1], [0], [0], [1], [0, 0, 1, 1], [], []>} : vector<8x32xf32>, vector<32x128xf32>, vector<8x128xf32> -> vector<8x128xf32>
    %4 = vector.broadcast %2 : vector<1x128xf32> to vector<8x128xf32>
    %5 = arith.addf %3, %4 : vector<8x128xf32>
    %cst_5 = arith.constant 0.000000e+00 : f32
    %6 = vector.broadcast %cst_5 : f32 to vector<8x128xf32>
    %7 = arith.maximumf %5, %6 : vector<8x128xf32>
    %c0_6 = arith.constant 0 : index
    %c0_7 = arith.constant 0 : index
    %8 = vector.load %arg4[%c0_6, %c0_7] : memref<128x128xf32, #tpu.memory_space<vmem>>, vector<128x128xf32>
    %c0_8 = arith.constant 0 : index
    %c0_9 = arith.constant 0 : index
    %9 = vector.load %arg5[%c0_8, %c0_9] : memref<1x128xf32, #tpu.memory_space<vmem>>, vector<1x128xf32>
    %cst_10 = arith.constant dense<0.000000e+00> : vector<8x128xf32>
    %10 = tpu.matmul %7, %8, %cst_10 {dimension_numbers = #tpu.dot_dimension_numbers<[1], [0], [0], [1], [0, 0, 1, 1], [], []>} : vector<8x128xf32>, vector<128x128xf32>, vector<8x128xf32> -> vector<8x128xf32>
    %11 = vector.broadcast %9 : vector<1x128xf32> to vector<8x128xf32>
    %12 = arith.addf %10, %11 : vector<8x128xf32>
    %cst_11 = arith.constant 0.000000e+00 : f32
    %13 = vector.broadcast %cst_11 : f32 to vector<8x128xf32>
    %14 = arith.maximumf %12, %13 : vector<8x128xf32>
    %c0_12 = arith.constant 0 : index
    %c0_13 = arith.constant 0 : index
    %15 = vector.load %arg6[%c0_12, %c0_13] : memref<1x128xf32, #tpu.memory_space<vmem>>, vector<1x128xf32>
    %c0_14 = arith.constant 0 : index
    %c0_15 = arith.constant 0 : index
    %16 = vector.load %arg7[%c0_14, %c0_15] : memref<1x1xf32, #tpu.memory_space<vmem>>, vector<1x1xf32>
    %17 = vector.broadcast %15 : vector<1x128xf32> to vector<8x128xf32>
    %18 = arith.mulf %14, %17 : vector<8x128xf32>
    %cst_16 = arith.constant dense<0.000000e+00> : vector<8xf32>
    %19 = vector.multi_reduction <add>, %18, %cst_16 [1] : vector<8x128xf32> to vector<8xf32>
    %20 = vector.shape_cast %19 : vector<8xf32> to vector<8x1xf32>
    %21 = vector.broadcast %16 : vector<1x1xf32> to vector<8x1xf32>
    %22 = arith.addf %20, %21 : vector<8x1xf32>
    %c0_17 = arith.constant 0 : index
    %c0_18 = arith.constant 0 : index
    %23 = vector.load %arg8[%c0_17, %c0_18] : memref<8x1xf32, #tpu.memory_space<vmem>>, vector<8x1xf32>
    tpu.vector_store %arg8[%c0_17, %c0_18], %22 {strides = array<i32>} : memref<8x1xf32, #tpu.memory_space<vmem>>, vector<8x1xf32>,
    return
  }
  func.func @transform_0(%arg0: i32) -> (i32, i32) {
    %c0_i32 = arith.constant 0 : i32
    %c0_i32_0 = arith.constant 0 : i32
    return %arg0, %c0_i32 : i32, i32
  }
  func.func @transform_1(%arg0: i32) -> (i32, i32) {
    %c0_i32 = arith.constant 0 : i32
    %c0_i32_0 = arith.constant 0 : i32
    %c0_i32_1 = arith.constant 0 : i32
    return %c0_i32, %c0_i32_0 : i32, i32
  }
  func.func @transform_2(%arg0: i32) -> (i32, i32) {
    %c0_i32 = arith.constant 0 : i32
    %c0_i32_0 = arith.constant 0 : i32
    %c0_i32_1 = arith.constant 0 : i32
    return %c0_i32, %c0_i32_0 : i32, i32
  }
  func.func @transform_3(%arg0: i32) -> (i32, i32) {
    %c0_i32 = arith.constant 0 : i32
    %c0_i32_0 = arith.constant 0 : i32
    %c0_i32_1 = arith.constant 0 : i32
    return %c0_i32, %c0_i32_0 : i32, i32
  }
  func.func @transform_4(%arg0: i32) -> (i32, i32) {
    %c0_i32 = arith.constant 0 : i32
    %c0_i32_0 = arith.constant 0 : i32
    %c0_i32_1 = arith.constant 0 : i32
    return %c0_i32, %c0_i32_0 : i32, i32
  }
  func.func @transform_5(%arg0: i32) -> (i32, i32) {
    %c0_i32 = arith.constant 0 : i32
    %c0_i32_0 = arith.constant 0 : i32
    %c0_i32_1 = arith.constant 0 : i32
    return %c0_i32, %c0_i32_0 : i32, i32
  }
  func.func @transform_6(%arg0: i32) -> (i32, i32) {
    %c0_i32 = arith.constant 0 : i32
    %c0_i32_0 = arith.constant 0 : i32
    %c0_i32_1 = arith.constant 0 : i32
    return %c0_i32, %c0_i32_0 : i32, i32
  }
  func.func @transform_7(%arg0: i32) -> (i32, i32) {
    %c0_i32 = arith.constant 0 : i32
    %c0_i32_0 = arith.constant 0 : i32
    return %arg0, %c0_i32 : i32, i32
  }
}

</mosaic_0001>

<bundles_post_ra>
// kernel: tpu_custom_call.1
= control target key start
LH: loop header
LB: loop body
LE: loop exit
PB: predicated region body
PF: predicated region fallthrough
CT: control target
= control target key end

     0   :  { %s511_s0 = inlined_call_operand.hbm [shape: f32[8,32], index: 0, kind: input, shape index: {}]   ;;  %s512_s1 = inlined_call_operand.hbm [shape: f32[32,128], index: 1, kind: input, shape index: {}]   ;;  %s513_s2 = inlined_call_operand.vmem [shape: f32[1,128], index: 2, kind: input, shape index: {}]   ;;  %s514_s3 = inlined_call_operand.hbm [shape: f32[128,128], index: 3, kind: input, shape index: {}]   ;;  %s515_s4 = inlined_call_operand.vmem [shape: f32[1,128], index: 4, kind: input, shape index: {}]   ;;  %s516_s5 = inlined_call_operand.vmem [shape: f32[1,128], index: 5, kind: input, shape index: {}]   ;;  %s517_s6 = inlined_call_operand.<no memory space> [shape: f32[1,1], index: 6, kind: input, shape index: {}]   ;;  %s518_s7 = inlined_call_operand.vmem [shape: f32[8,1], index: 7, kind: output, shape index: {}]  }
   0x1   :  { %v12_v0 = vstv %s517_s6 }
   0x2   :  { %13 = vst [vmem:[#allocation2] sm:$0x1] %v12_v0 }
   0x3   :  { %14 = vsyncpa [#allocation4], 0 }
   0x4   :  { %15 = vsyncpa [#allocation6], 0  ;;  %s418_s26 = smov [#allocation5]  }
   0x5   :  { %s31_s27 = sshll.u32 %s418_s26, 4  ;;  %s32_s27 = int_to_ptr.vmem [resolvable:$true] %s31_s27 }
   0x6   :  { %s362_s28 = scalar_lea.vmem %s32_s27, 512  ;;  %p367_p1 = scmp.lt.s32.totalorder %s32_s27, %s32_s27 }
   0x7   :  { %p363_p0 = scmp.ne.s32.totalorder %s32_s27, %s362_s28  ;;  %p368_p2 = scmp.lt.s32.totalorder %s362_s28, %s362_s28 }
   0x9   :  { %p369_p3 = por %p368_p2, %p367_p1 }
   0xb   :  { %p370_p4 = pnand %p369_p3, %p363_p0 }
   0xd   :  { %373 = shalt.err (!%p370_p4)
}
   0xe   :  { %s419_s29 = smov 128   ;;  %s420_s30 = smov 8  }
   0xf   :  { %37 = dma.hbm_to_vmem [thread:$0]  %s512_s1, 512, %s32_s27, [#allocation6], %s419_s29, %s419_s29, %s420_s30  }
  0x10   :  { %s421_s6 = smov [#allocation3]   ;;  %s422_s11 = smov [#allocation7]  }
  0x11   :  { %s22_s10 = sshll.u32 %s421_s6, 4  ;;  %s45_s12 = sshll.u32 %s422_s11, 4  ;;  %s23_s10 = int_to_ptr.vmem [resolvable:$true] %s22_s10  ;;  %s46_s12 = int_to_ptr.vmem [resolvable:$true] %s45_s12 }
  0x12   :  { %s382_s13 = scalar_lea.vmem %s23_s10, 128  ;;  %p387_p6 = scmp.lt.s32.totalorder %s23_s10, %s23_s10 }
  0x13   :  { %p383_p5 = scmp.ne.s32.totalorder %s23_s10, %s382_s13  ;;  %p388_p7 = scmp.lt.s32.totalorder %s382_s13, %s382_s13 }
  0x15   :  { %p389_p8 = por %p388_p7, %p387_p6 }
  0x17   :  { %p390_p9 = pnand %p389_p8, %p383_p5 }
  0x19   :  { %393 = shalt.err (!%p390_p9)
}
  0x1a   :  { %25 = dma.hbm_to_vmem [thread:$0]  %s511_s0, 128, %s23_s10, [#allocation4]  }
  0x1b   :  { %s402_s16 = scalar_lea.vmem %s46_s12, 2048  ;;  %p407_p11 = scmp.lt.s32.totalorder %s46_s12, %s46_s12 }
  0x1c   :  { %p403_p10 = scmp.ne.s32.totalorder %s46_s12, %s402_s16  ;;  %p408_p12 = scmp.lt.s32.totalorder %s402_s16, %s402_s16 }
  0x1e   :  { %p409_p13 = por %p408_p12, %p407_p11 }
  0x20   :  { %p410_p0 = pnand %p409_p13, %p403_p10 }
  0x22   :  { %413 = shalt.err (!%p410_p0)
}
  0x23   :  { %51 = dma.hbm_to_vmem [thread:$0]  %s514_s3, 2048, %s46_s12, [#allocation6], %s419_s29, %s419_s29, %s420_s30  }
  0x24   :  { %414 = dma.done.wait [#allocation4], 128  }
  0x25   :  { %415 = vsyncadd [#allocation4], 4294967168 }
  0x26   :  { %416 = dma.done.wait [#allocation6], 2560  }
  0x27   :  { %417 = vsyncadd [#allocation6], 4294964736  ;;  %v423_v1 = vmov 0.0   ;;  %vm424_vm0 = vmmov 0   ;;  %v71_v2 = vld [vmem:[#allocation5 + $0x18] sm:$0xff]  ;;  %v70_v3 = vld [vmem:[#allocation5 + $0x10] sm:$0xff] }
  0x28   :  { %301 = vmatprep.subr.mxu0 %v423_v1  ;;  %309 = vmatprep.mubr.msk.f32.mxu0 %vm424_vm0, %v423_v1  ;;  %v169_v4 = vld [vmem:[#allocation7 + $0x78] sm:$0xff]  ;;  %v69_v5 = vld [vmem:[#allocation5 + $0x8] sm:$0xff]  ;;  %v168_v6 = vld [vmem:[#allocation7 + $0x70] sm:$0xff]  ;;  %vm79_vm1 = vcmask 261120   ;;  %vm266_vm2 = vcmask 7168  }
  0x29   :  { %312 = vmatprep.subr.mxu1 %v423_v1  ;;  %344 = vmatprep.mubr.msk.f32.mxu1 %vm424_vm0, %v423_v1  ;;  %v167_v7 = vld [vmem:[#allocation7 + $0x68] sm:$0xff]  ;;  %v68_v8 = vld [vmem:[#allocation5] sm:$0xff]  ;;  %v67_v9 = vld [vmem:[#allocation3] sm:$0xff] }
  0x2a   :  { %302 = vmatpush3.msra.mxu0 %v71_v2  ;;  %313 = vmatpush3.msra.mxu1 %v169_v4  ;;  %v166_v10 = vld [vmem:[#allocation7 + $0x60] sm:$0xff]  ;;  %v165_v11 = vld [vmem:[#allocation7 + $0x58] sm:$0xff]  ;;  %v164_v12 = vld [vmem:[#allocation7 + $0x50] sm:$0xff] }
  0x2b   :  { %303 = vmatprep.subr.mxu0 %v423_v1  ;;  %314 = vmatprep.subr.mxu1 %v423_v1  ;;  %v163_v13 = vld [vmem:[#allocation7 + $0x48] sm:$0xff]  ;;  %v162_v14 = vld [vmem:[#allocation7 + $0x40] sm:$0xff]  ;;  %v161_v15 = vld [vmem:[#allocation7 + $0x38] sm:$0xff] }
  0x2c   :  { %304 = vmatpush3.msra.mxu0 %v70_v3  ;;  %315 = vmatpush3.msra.mxu1 %v168_v6  ;;  %v160_v16 = vld [vmem:[#allocation7 + $0x30] sm:$0xff]  ;;  %v159_v17 = vld [vmem:[#allocation7 + $0x28] sm:$0xff]  ;;  %v158_v18 = vld [vmem:[#allocation7 + $0x20] sm:$0xff] }
  0x2d   :  { %305 = vmatprep.subr.mxu0 %v423_v1  ;;  %316 = vmatprep.subr.mxu1 %v423_v1  ;;  %v157_v19 = vld [vmem:[#allocation7 + $0x18] sm:$0xff]  ;;  %v156_v20 = vld [vmem:[#allocation7 + $0x10] sm:$0xff]  ;;  %v155_v21 = vld [vmem:[#allocation7 + $0x8] sm:$0xff] }
  0x2e   :  { %306 = vmatpush3.msra.mxu0 %v69_v5  ;;  %317 = vmatpush3.msra.mxu1 %v167_v7  ;;  %v154_v22 = vld [vmem:[#allocation7] sm:$0xff]  ;;  %v274_v23 = vld [vmem:[%s513_s2] ss:$0 sm:$0xff] }
  0x2f   :  { %307 = vmatprep.subr.mxu0 %v423_v1  ;;  %318 = vmatprep.subr.mxu1 %v423_v1  ;;  %v276_v28 = vld [vmem:[%s515_s4] ss:$0 sm:$0xff] }
  0x30   :  { %308 = vmatpush3.msra.mxu0 %v68_v8  ;;  %319 = vmatpush3.msra.mxu1 %v166_v10  ;;  %v277_v32 = vld [vmem:[%s516_s5] ss:$0 sm:$0xff] }
  0x31   :  { %310 = vmatmul.mubr.msk.f32.vlgmr.msra.gmra.mxu0 %vm79_vm1, %v67_v9  ;;  %320 = vmatprep.subr.mxu1 %v423_v1  ;;  %v278_v35 = vld [vmem:[#allocation2] ss:$0 sm:$0xff] }
  0x32   :  { %321 = vmatpush3.msra.mxu1 %v165_v11 }
  0x33   :  { %322 = vmatprep.subr.mxu1 %v423_v1 }
  0x34   :  { %323 = vmatpush3.msra.mxu1 %v164_v12 }
  0x35   :  { %324 = vmatprep.subr.mxu1 %v423_v1 }
  0x36   :  { %325 = vmatpush3.msra.mxu1 %v163_v13 }
  0x37   :  { %326 = vmatprep.subr.mxu1 %v423_v1 }
  0x38   :  { %327 = vmatpush3.msra.mxu1 %v162_v14 }
  0x39   :  { %328 = vmatprep.subr.mxu1 %v423_v1 }
  0x3a   :  { %329 = vmatpush3.msra.mxu1 %v161_v15 }
  0x3b   :  { %330 = vmatprep.subr.mxu1 %v423_v1 }
  0x3c   :  { %331 = vmatpush3.msra.mxu1 %v160_v16 }
  0x3d   :  { %332 = vmatprep.subr.mxu1 %v423_v1 }
  0x3e   :  { %333 = vmatpush3.msra.mxu1 %v159_v17 }
  0x3f   :  { %334 = vmatprep.subr.mxu1 %v423_v1 }
  0x40   :  { %335 = vmatpush3.msra.mxu1 %v158_v18 }
  0x41   :  { %336 = vmatprep.subr.mxu1 %v423_v1 }
  0x42   :  { %337 = vmatpush3.msra.mxu1 %v157_v19 }
  0x43   :  { %338 = vmatprep.subr.mxu1 %v423_v1 }
  0x44   :  { %339 = vmatpush3.msra.mxu1 %v156_v20 }
  0x45   :  { %340 = vmatprep.subr.mxu1 %v423_v1 }
  0x46   :  { %341 = vmatpush3.msra.mxu1 %v155_v21 }
  0x47   :  { %342 = vmatprep.subr.mxu1 %v423_v1 }
  0x48   :  { %343 = vmatpush3.msra.mxu1 %v154_v22 }
  0xf1   :  { %v149_v24 = vpop.f32.mrf.mxu0 }
  0xf2   :  { %v150_v25 = vadd.f32 %v274_v23, %v149_v24 }
  0xf3   :  { %v311_v26 = vpop.f32.mrf.mxu0 }
  0xf4   :  { %v153_v27 = vmax.f32 %v150_v25, 0.0 }
  0xf6   :  { %345 = vmatmul.mubr.f32.vlgmr.msra.gmra.mxu1 %v153_v27 }
 0x1b6   :  { %v243_v29 = vpop.f32.mrf.mxu1 }
 0x1b7   :  { %v244_v30 = vadd.f32 %v276_v28, %v243_v29 }
 0x1b8   :  { %v346_v31 = vpop.f32.mrf.mxu1 }
 0x1b9   :  { %v247_v33 = vmax.f32 %v244_v30, 0.0 }
 0x1bb   :  { %v256_v34 = vmul.f32 %v277_v32, %v247_v33 }
 0x1bd   :  { %257 = vadd.xlane.f32.xlu0 %v256_v34 }
 0x246   :  { %v258_v36 = vpop.xlane.xlu0 %257 }
 0x247   :  { %v265_v37 = vadd.f32 %v278_v35, %v258_v36 }
 0x249   :  { %267 = vst.msk [vmem:[%s518_s7] sm:$0xff] %vm266_vm2, %v265_v37 }
 0x24a   :  { %272 = vsyncpa [#allocation4], 1 }
 0x24b   :  { %273 = vsyncpa [#allocation6], 1 }

// kernel: tpu_custom_call.1
= control target key start
LH: loop header
LB: loop body
LE: loop exit
PB: predicated region body
PF: predicated region fallthrough
CT: control target
= control target key end

     0   :  { %s511_s0 = inlined_call_operand.hbm [shape: f32[8,32], index: 0, kind: input, shape index: {}]   ;;  %s512_s1 = inlined_call_operand.hbm [shape: f32[32,128], index: 1, kind: input, shape index: {}]   ;;  %s513_s2 = inlined_call_operand.vmem [shape: f32[1,128], index: 2, kind: input, shape index: {}]   ;;  %s514_s3 = inlined_call_operand.hbm [shape: f32[128,128], index: 3, kind: input, shape index: {}]   ;;  %s515_s4 = inlined_call_operand.vmem [shape: f32[1,128], index: 4, kind: input, shape index: {}]   ;;  %s516_s5 = inlined_call_operand.vmem [shape: f32[1,128], index: 5, kind: input, shape index: {}]   ;;  %s517_s6 = inlined_call_operand.<no memory space> [shape: f32[1,1], index: 6, kind: input, shape index: {}]   ;;  %s518_s7 = inlined_call_operand.vmem [shape: f32[8,1], index: 7, kind: output, shape index: {}]  }
   0x1   :  { %v12_v0 = vstv %s517_s6 }
   0x2   :  { %13 = vst [vmem:[#allocation2] sm:$0x1] %v12_v0 }
   0x3   :  { %14 = vsyncpa [#allocation4], 0 }
   0x4   :  { %15 = vsyncpa [#allocation6], 0  ;;  %s418_s26 = smov [#allocation5]  }
   0x5   :  { %s31_s27 = sshll.u32 %s418_s26, 4  ;;  %s32_s27 = int_to_ptr.vmem [resolvable:$true] %s31_s27 }
   0x6   :  { %s362_s28 = scalar_lea.vmem %s32_s27, 512  ;;  %p367_p1 = scmp.lt.s32.totalorder %s32_s27, %s32_s27 }
   0x7   :  { %p363_p0 = scmp.ne.s32.totalorder %s32_s27, %s362_s28  ;;  %p368_p2 = scmp.lt.s32.totalorder %s362_s28, %s362_s28 }
   0x9   :  { %p369_p3 = por %p368_p2, %p367_p1 }
   0xb   :  { %p370_p4 = pnand %p369_p3, %p363_p0 }
   0xd   :  { %373 = shalt.err (!%p370_p4)
}
   0xe   :  { %s419_s29 = smov 128   ;;  %s420_s30 = smov 8  }
   0xf   :  { %37 = dma.hbm_to_vmem [thread:$0]  %s512_s1, 512, %s32_s27, [#allocation6], %s419_s29, %s419_s29, %s420_s30  }
  0x10   :  { %s421_s6 = smov [#allocation3]   ;;  %s422_s11 = smov [#allocation7]  }
  0x11   :  { %s22_s10 = sshll.u32 %s421_s6, 4  ;;  %s45_s12 = sshll.u32 %s422_s11, 4  ;;  %s23_s10 = int_to_ptr.vmem [resolvable:$true] %s22_s10  ;;  %s46_s12 = int_to_ptr.vmem [resolvable:$true] %s45_s12 }
  0x12   :  { %s382_s13 = scalar_lea.vmem %s23_s10, 128  ;;  %p387_p6 = scmp.lt.s32.totalorder %s23_s10, %s23_s10 }
  0x13   :  { %p383_p5 = scmp.ne.s32.totalorder %s23_s10, %s382_s13  ;;  %p388_p7 = scmp.lt.s32.totalorder %s382_s13, %s382_s13 }
  0x15   :  { %p389_p8 = por %p388_p7, %p387_p6 }
  0x17   :  { %p390_p9 = pnand %p389_p8, %p383_p5 }
  0x19   :  { %393 = shalt.err (!%p390_p9)
}
  0x1a   :  { %25 = dma.hbm_to_vmem [thread:$0]  %s511_s0, 128, %s23_s10, [#allocation4]  }
  0x1b   :  { %s402_s16 = scalar_lea.vmem %s46_s12, 2048  ;;  %p407_p11 = scmp.lt.s32.totalorder %s46_s12, %s46_s12 }
  0x1c   :  { %p403_p10 = scmp.ne.s32.totalorder %s46_s12, %s402_s16  ;;  %p408_p12 = scmp.lt.s32.totalorder %s402_s16, %s402_s16 }
  0x1e   :  { %p409_p13 = por %p408_p12, %p407_p11 }
  0x20   :  { %p410_p0 = pnand %p409_p13, %p403_p10 }
  0x22   :  { %413 = shalt.err (!%p410_p0)
}
  0x23   :  { %51 = dma.hbm_to_vmem [thread:$0]  %s514_s3, 2048, %s46_s12, [#allocation6], %s419_s29, %s419_s29, %s420_s30  }
  0x24   :  { %414 = dma.done.wait [#allocation4], 128  }
  0x25   :  { %415 = vsyncadd [#allocation4], 4294967168 }
  0x26   :  { %416 = dma.done.wait [#allocation6], 2560  }
  0x27   :  { %417 = vsyncadd [#allocation6], 4294964736  ;;  %v423_v1 = vmov 0.0   ;;  %vm424_vm0 = vmmov 0   ;;  %v71_v2 = vld [vmem:[#allocation5 + $0x18] sm:$0xff]  ;;  %v70_v3 = vld [vmem:[#allocation5 + $0x10] sm:$0xff] }
  0x28   :  { %301 = vmatprep.subr.mxu0 %v423_v1  ;;  %309 = vmatprep.mubr.msk.f32.mxu0 %vm424_vm0, %v423_v1  ;;  %v169_v4 = vld [vmem:[#allocation7 + $0x78] sm:$0xff]  ;;  %v69_v5 = vld [vmem:[#allocation5 + $0x8] sm:$0xff]  ;;  %v168_v6 = vld [vmem:[#allocation7 + $0x70] sm:$0xff]  ;;  %vm79_vm1 = vcmask 261120   ;;  %vm266_vm2 = vcmask 7168  }
  0x29   :  { %312 = vmatprep.subr.mxu1 %v423_v1  ;;  %344 = vmatprep.mubr.msk.f32.mxu1 %vm424_vm0, %v423_v1  ;;  %v167_v7 = vld [vmem:[#allocation7 + $0x68] sm:$0xff]  ;;  %v68_v8 = vld [vmem:[#allocation5] sm:$0xff]  ;;  %v67_v9 = vld [vmem:[#allocation3] sm:$0xff] }
  0x2a   :  { %302 = vmatpush3.msra.mxu0 %v71_v2  ;;  %313 = vmatpush3.msra.mxu1 %v169_v4  ;;  %v166_v10 = vld [vmem:[#allocation7 + $0x60] sm:$0xff]  ;;  %v165_v11 = vld [vmem:[#allocation7 + $0x58] sm:$0xff]  ;;  %v164_v12 = vld [vmem:[#allocation7 + $0x50] sm:$0xff] }
  0x2b   :  { %303 = vmatprep.subr.mxu0 %v423_v1  ;;  %314 = vmatprep.subr.mxu1 %v423_v1  ;;  %v163_v13 = vld [vmem:[#allocation7 + $0x48] sm:$0xff]  ;;  %v162_v14 = vld [vmem:[#allocation7 + $0x40] sm:$0xff]  ;;  %v161_v15 = vld [vmem:[#allocation7 + $0x38] sm:$0xff] }
  0x2c   :  { %304 = vmatpush3.msra.mxu0 %v70_v3  ;;  %315 = vmatpush3.msra.mxu1 %v168_v6  ;;  %v160_v16 = vld [vmem:[#allocation7 + $0x30] sm:$0xff]  ;;  %v159_v17 = vld [vmem:[#allocation7 + $0x28] sm:$0xff]  ;;  %v158_v18 = vld [vmem:[#allocation7 + $0x20] sm:$0xff] }
  0x2d   :  { %305 = vmatprep.subr.mxu0 %v423_v1  ;;  %316 = vmatprep.subr.mxu1 %v423_v1  ;;  %v157_v19 = vld [vmem:[#allocation7 + $0x18] sm:$0xff]  ;;  %v156_v20 = vld [vmem:[#allocation7 + $0x10] sm:$0xff]  ;;  %v155_v21 = vld [vmem:[#allocation7 + $0x8] sm:$0xff] }
  0x2e   :  { %306 = vmatpush3.msra.mxu0 %v69_v5  ;;  %317 = vmatpush3.msra.mxu1 %v167_v7  ;;  %v154_v22 = vld [vmem:[#allocation7] sm:$0xff]  ;;  %v274_v23 = vld [vmem:[%s513_s2] ss:$0 sm:$0xff] }
  0x2f   :  { %307 = vmatprep.subr.mxu0 %v423_v1  ;;  %318 = vmatprep.subr.mxu1 %v423_v1  ;;  %v276_v28 = vld [vmem:[%s515_s4] ss:$0 sm:$0xff] }
  0x30   :  { %308 = vmatpush3.msra.mxu0 %v68_v8  ;;  %319 = vmatpush3.msra.mxu1 %v166_v10  ;;  %v277_v32 = vld [vmem:[%s516_s5] ss:$0 sm:$0xff] }
  0x31   :  { %310 = vmatmul.mubr.msk.f32.vlgmr.msra.gmra.mxu0 %vm79_vm1, %v67_v9  ;;  %320 = vmatprep.subr.mxu1 %v423_v1  ;;  %v278_v35 = vld [vmem:[#allocation2] ss:$0 sm:$0xff] }
  0x32   :  { %321 = vmatpush3.msra.mxu1 %v165_v11 }
  0x33   :  { %322 = vmatprep.subr.mxu1 %v423_v1 }
  0x34   :  { %323 = vmatpush3.msra.mxu1 %v164_v12 }
  0x35   :  { %324 = vmatprep.subr.mxu1 %v423_v1 }
  0x36   :  { %325 = vmatpush3.msra.mxu1 %v163_v13 }
  0x37   :  { %326 = vmatprep.subr.mxu1 %v423_v1 }
  0x38   :  { %327 = vmatpush3.msra.mxu1 %v162_v14 }
  0x39   :  { %328 = vmatprep.subr.mxu1 %v423_v1 }
  0x3a   :  { %329 = vmatpush3.msra.mxu1 %v161_v15 }
  0x3b   :  { %330 = vmatprep.subr.mxu1 %v423_v1 }
  0x3c   :  { %331 = vmatpush3.msra.mxu1 %v160_v16 }
  0x3d   :  { %332 = vmatprep.subr.mxu1 %v423_v1 }
  0x3e   :  { %333 = vmatpush3.msra.mxu1 %v159_v17 }
  0x3f   :  { %334 = vmatprep.subr.mxu1 %v423_v1 }
  0x40   :  { %335 = vmatpush3.msra.mxu1 %v158_v18 }
  0x41   :  { %336 = vmatprep.subr.mxu1 %v423_v1 }
  0x42   :  { %337 = vmatpush3.msra.mxu1 %v157_v19 }
  0x43   :  { %338 = vmatprep.subr.mxu1 %v423_v1 }
  0x44   :  { %339 = vmatpush3.msra.mxu1 %v156_v20 }
  0x45   :  { %340 = vmatprep.subr.mxu1 %v423_v1 }
  0x46   :  { %341 = vmatpush3.msra.mxu1 %v155_v21 }
  0x47   :  { %342 = vmatprep.subr.mxu1 %v423_v1 }
  0x48   :  { %343 = vmatpush3.msra.mxu1 %v154_v22 }
  0xf1   :  { %v149_v24 = vpop.f32.mrf.mxu0 }
  0xf2   :  { %v150_v25 = vadd.f32 %v274_v23, %v149_v24 }
  0xf3   :  { %v311_v26 = vpop.f32.mrf.mxu0 }
  0xf4   :  { %v153_v27 = vmax.f32 %v150_v25, 0.0 }
  0xf6   :  { %345 = vmatmul.mubr.f32.vlgmr.msra.gmra.mxu1 %v153_v27 }
 0x1b6   :  { %v243_v29 = vpop.f32.mrf.mxu1 }
 0x1b7   :  { %v244_v30 = vadd.f32 %v276_v28, %v243_v29 }
 0x1b8   :  { %v346_v31 = vpop.f32.mrf.mxu1 }
 0x1b9   :  { %v247_v33 = vmax.f32 %v244_v30, 0.0 }
 0x1bb   :  { %v256_v34 = vmul.f32 %v277_v32, %v247_v33 }
 0x1bd   :  { %257 = vadd.xlane.f32.xlu0 %v256_v34 }
 0x246   :  { %v258_v36 = vpop.xlane.xlu0 %257 }
 0x247   :  { %v265_v37 = vadd.f32 %v278_v35, %v258_v36 }
 0x249   :  { %267 = vst.msk [vmem:[%s518_s7] sm:$0xff] %vm266_vm2, %v265_v37 }
 0x24a   :  { %272 = vsyncpa [#allocation4], 1 }
 0x24b   :  { %273 = vsyncpa [#allocation6], 1 }

</bundles_post_ra>
